<compile_context>
chip_gen: v5e
topology: v5e:2x2
jax: 0.10.0
libtpu: 0.0.40
codegen_flags: <defaults>
</compile_context>

<pallas_src>
import functools

import jax
import jax.numpy as jnp
from jax.experimental import pallas as pl
from jax.experimental.pallas import tpu as pltpu


def _layernorm3d_kernel(x_ref, w_ref, b_ref, o_ref, *, eps, true_s, s_pad):
    # x_ref/o_ref: (row_tile, S_pad); w_ref/b_ref: (row_tile, 1)
    x = x_ref[...].astype(jnp.float32)

    if s_pad != true_s:
        lane = jax.lax.broadcasted_iota(jnp.int32, x.shape, 1)
        xm = jnp.where(lane < true_s, x, 0.0)
    else:
        xm = x

    inv_n = 1.0 / float(true_s)
    s1 = jnp.sum(xm, axis=-1, keepdims=True)           # (row_tile, 1)
    s2 = jnp.sum(xm * xm, axis=-1, keepdims=True)      # (row_tile, 1)
    mean = s1 * inv_n
    var = s2 * inv_n - mean * mean                     # biased (unbiased=False)
    inv = jax.lax.rsqrt(var + eps)

    w = w_ref[...].astype(jnp.float32)                 # (row_tile, 1)
    b = b_ref[...].astype(jnp.float32)                 # (row_tile, 1)
    a = inv * w
    c = b - mean * a
    o_ref[...] = (x * a + c).astype(o_ref.dtype)


def _ceil_to(x, m):
    return (x + m - 1) // m * m


def layer_norm_3d(x, weight, bias, eps=1e-6):
    """x: (N, C, D, H, W); weight, bias: (C,). Matches torch LayerNorm3d.forward."""
    N, C, D, H, W = x.shape
    S = D * H * W
    R = N * C
    itemsize = jnp.dtype(x.dtype).itemsize

    # Lane-dense spatial axis.
    S_pad = _ceil_to(S, 128)

    # Row tile: multiple of 8 sublanes, sized so
    #   2x input tile + 2x output tile (I/O dtype) + ~2x f32 temporaries
    # stay under ~8 MiB per block (fits default scoped VMEM on v5e/v6e/v7x).
    budget_bytes = 8 * 1024 * 1024
    bytes_per_row = S_pad * (4 * itemsize + 2 * 4)
    max_rows_budget = max(8, (budget_bytes // bytes_per_row) // 8 * 8)

    R8 = _ceil_to(R, 8)
    row_tile = min(R8, max_rows_budget)
    # Give the grid >= 2 steps when possible (v7x megacore / pipelining).
    if R8 // row_tile < 2 and R8 >= 16:
        row_tile = max(8, (R8 // 2) // 8 * 8)
    R_pad = _ceil_to(R8, row_tile)
    grid = (R_pad // row_tile,)

    # Flatten + pad. Padded rows/lanes are zeros and are sliced off below;
    # padded lanes are masked out of the statistics inside the kernel.
    x2 = x.reshape(R, S)
    if (R_pad != R) or (S_pad != S):
        x2 = jnp.pad(x2, ((0, R_pad - R), (0, S_pad - S)))

    # Per-row affine params: row r = n*C + c  ->  weight[r % C].
    w_row = jnp.tile(weight, N).reshape(R, 1)
    b_row = jnp.tile(bias, N).reshape(R, 1)
    if R_pad != R:
        w_row = jnp.pad(w_row, ((0, R_pad - R), (0, 0)))
        b_row = jnp.pad(b_row, ((0, R_pad - R), (0, 0)))

    cost = pl.CostEstimate(
        flops=8 * R * S,
        transcendentals=R,
        bytes_accessed=2 * R * S * itemsize + 2 * R * 4,
    )

    out = pl.pallas_call(
        functools.partial(_layernorm3d_kernel, eps=eps, true_s=S, s_pad=S_pad),
        out_shape=jax.ShapeDtypeStruct((R_pad, S_pad), x.dtype),
        grid=grid,
        in_specs=[
            pl.BlockSpec((row_tile, S_pad), lambda r: (r, 0)),
            pl.BlockSpec((row_tile, 1), lambda r: (r, 0)),
            pl.BlockSpec((row_tile, 1), lambda r: (r, 0)),
        ],
        out_specs=pl.BlockSpec((row_tile, S_pad), lambda r: (r, 0)),
        compiler_params=pltpu.CompilerParams(
            dimension_semantics=("parallel",),
            vmem_limit_bytes=32 * 1024 * 1024,
        ),
        cost_estimate=cost,
    )(x2, w_row, b_row)

    return out[:R, :S].reshape(N, C, D, H, W)


def _reference(x, weight, bias, eps=1e-6):
    mean = jnp.mean(x, axis=(2, 3, 4), keepdims=True)
    var = jnp.var(x, axis=(2, 3, 4), keepdims=True)  # biased, like unbiased=False
    xn = (x - mean) / jnp.sqrt(var + eps)
    return xn * weight[None, :, None, None, None] + bias[None, :, None, None, None]


if __name__ == "__main__":
    key = jax.random.PRNGKey(0)
    N, C, D, H, W = 2, 4, 4, 8, 16  # small NCDHW input

    kx, kw, kb = jax.random.split(key, 3)
    x = jax.random.normal(kx, (N, C, D, H, W), dtype=jnp.float32)
    # Module init is ones/zeros; use random affine to exercise the full path.
    weight = 1.0 + 0.1 * jax.random.normal(kw, (C,), dtype=jnp.float32)
    bias = 0.1 * jax.random.normal(kb, (C,), dtype=jnp.float32)

    y = layer_norm_3d(x, weight, bias, eps=1e-6)
    y = jax.block_until_ready(y)

    y_ref = _reference(x, weight, bias, eps=1e-6)
    assert y.shape == x.shape
    assert jnp.allclose(y, y_ref, atol=1e-5, rtol=1e-5)

    # Also test a shape whose spatial size is NOT a multiple of 128 (masking path).
    x2 = jax.random.normal(kx, (2, 4, 7, 7, 7), dtype=jnp.float32)
    y2 = jax.block_until_ready(layer_norm_3d(x2, weight, bias, eps=1e-6))
    assert jnp.allclose(y2, _reference(x2, weight, bias, eps=1e-6), atol=1e-5, rtol=1e-5)

    print("KERNEL_OK")
</pallas_src>

<mosaic_0001>
module attributes {stable_mosaic.version = 11 : i64} {
  func.func @_layernorm3d_kernel(%arg0: i32, %arg1: memref<8x512xf32, #tpu.memory_space<vmem>>, %arg2: memref<8x1xf32, #tpu.memory_space<vmem>>, %arg3: memref<8x1xf32, #tpu.memory_space<vmem>>, %arg4: memref<8x512xf32, #tpu.memory_space<vmem>>) attributes {dimension_semantics = [#tpu.dimension_semantics<parallel>], iteration_bounds = array<i64: 1>, scalar_prefetch = 0 : i64, scratch_operands = 0 : i64, tpu.core_type = #tpu.core_type<tc>, window_params = [{transform_indices = @transform_0, window_bounds = array<i64: 8, 512>}, {transform_indices = @transform_1, window_bounds = array<i64: 8, 1>}, {transform_indices = @transform_2, window_bounds = array<i64: 8, 1>}, {transform_indices = @transform_3, window_bounds = array<i64: 8, 512>}]} {
    %c0 = arith.constant 0 : index
    %c0_0 = arith.constant 0 : index
    %0 = vector.load %arg1[%c0, %c0_0] : memref<8x512xf32, #tpu.memory_space<vmem>>, vector<8x512xf32>
    %cst = arith.constant dense<0.000000e+00> : vector<8xf32>
    %1 = vector.multi_reduction <add>, %0, %cst [1] : vector<8x512xf32> to vector<8xf32>
    %2 = vector.shape_cast %1 : vector<8xf32> to vector<8x1xf32>
    %3 = arith.mulf %0, %0 : vector<8x512xf32>
    %cst_1 = arith.constant dense<0.000000e+00> : vector<8xf32>
    %4 = vector.multi_reduction <add>, %3, %cst_1 [1] : vector<8x512xf32> to vector<8xf32>
    %5 = vector.shape_cast %4 : vector<8xf32> to vector<8x1xf32>
    %cst_2 = arith.constant 0.001953125 : f32
    %6 = vector.broadcast %cst_2 : f32 to vector<8x1xf32>
    %7 = arith.mulf %2, %6 : vector<8x1xf32>
    %cst_3 = arith.constant 0.001953125 : f32
    %8 = vector.broadcast %cst_3 : f32 to vector<8x1xf32>
    %9 = arith.mulf %5, %8 : vector<8x1xf32>
    %10 = arith.mulf %7, %7 : vector<8x1xf32>
    %11 = arith.subf %9, %10 : vector<8x1xf32>
    %cst_4 = arith.constant 9.99999997E-7 : f32
    %12 = vector.broadcast %cst_4 : f32 to vector<8x1xf32>
    %13 = arith.addf %11, %12 : vector<8x1xf32>
    %14 = math.rsqrt %13 : vector<8x1xf32>
    %c0_5 = arith.constant 0 : index
    %c0_6 = arith.constant 0 : index
    %15 = vector.load %arg2[%c0_5, %c0_6] : memref<8x1xf32, #tpu.memory_space<vmem>>, vector<8x1xf32>
    %c0_7 = arith.constant 0 : index
    %c0_8 = arith.constant 0 : index
    %16 = vector.load %arg3[%c0_7, %c0_8] : memref<8x1xf32, #tpu.memory_space<vmem>>, vector<8x1xf32>
    %17 = arith.mulf %14, %15 : vector<8x1xf32>
    %18 = arith.mulf %7, %17 : vector<8x1xf32>
    %19 = arith.subf %16, %18 : vector<8x1xf32>
    %20 = vector.broadcast %17 : vector<8x1xf32> to vector<8x512xf32>
    %21 = arith.mulf %0, %20 : vector<8x512xf32>
    %22 = vector.broadcast %19 : vector<8x1xf32> to vector<8x512xf32>
    %23 = arith.addf %21, %22 : vector<8x512xf32>
    %c0_9 = arith.constant 0 : index
    %c0_10 = arith.constant 0 : index
    %24 = vector.load %arg4[%c0_9, %c0_10] : memref<8x512xf32, #tpu.memory_space<vmem>>, vector<8x512xf32>
    tpu.vector_store %arg4[%c0_9, %c0_10], %23 {strides = array<i32>} : memref<8x512xf32, #tpu.memory_space<vmem>>, vector<8x512xf32>,
    return
  }
  func.func @transform_0(%arg0: i32) -> (i32, i32) {
    %c0_i32 = arith.constant 0 : i32
    %c0_i32_0 = arith.constant 0 : i32
    return %arg0, %c0_i32 : i32, i32
  }
  func.func @transform_1(%arg0: i32) -> (i32, i32) {
    %c0_i32 = arith.constant 0 : i32
    %c0_i32_0 = arith.constant 0 : i32
    return %arg0, %c0_i32 : i32, i32
  }
  func.func @transform_2(%arg0: i32) -> (i32, i32) {
    %c0_i32 = arith.constant 0 : i32
    %c0_i32_0 = arith.constant 0 : i32
    return %arg0, %c0_i32 : i32, i32
  }
  func.func @transform_3(%arg0: i32) -> (i32, i32) {
    %c0_i32 = arith.constant 0 : i32
    %c0_i32_0 = arith.constant 0 : i32
    return %arg0, %c0_i32 : i32, i32
  }
}

</mosaic_0001>

<bundles_post_ra>
// kernel: tpu_custom_call.1
= control target key start
LH: loop header
LB: loop body
LE: loop exit
PB: predicated region body
PF: predicated region fallthrough
CT: control target
= control target key end

     0   :  { %8 = vsyncpa [#allocation3], 0  ;;  %s200_s0 = inlined_call_operand.hbm [shape: f32[8,512], index: 0, kind: input, shape index: {}]   ;;  %s201_s1 = inlined_call_operand.vmem [shape: f32[8,1], index: 1, kind: input, shape index: {}]   ;;  %s202_s2 = inlined_call_operand.vmem [shape: f32[8,1], index: 2, kind: input, shape index: {}]   ;;  %s203_s3 = inlined_call_operand.hbm [shape: f32[8,512], index: 3, kind: output, shape index: {}]  }
   0x1   :  { %9 = vsyncpa [#allocation4], 0  ;;  %s15_s14 = sshll.u32 %s200_s0, 4  ;;  %s165_s15 = smov [#allocation2]   ;;  %s16_s14 = int_to_ptr.hbm [resolvable:$true] %s15_s14 }
   0x2   :  { %s17_s16 = sshll.u32 %s165_s15, 4  ;;  %s18_s16 = int_to_ptr.vmem [resolvable:$true] %s17_s16 }
   0x3   :  { %20 = dma.hbm_to_vmem [thread:$0]  %s16_s14, 512, %s18_s16, [#allocation3]  }
   0x4   :  { %161 = dma.done.wait [#allocation3], 512  }
   0x5   :  { %162 = vsyncadd [#allocation3], 4294966784  ;;  %v29_v0 = vld [vmem:[#allocation2] sm:$0xff]  ;;  %v30_v1 = vld [vmem:[#allocation2 + $0x8] sm:$0xff]  ;;  %v166_v14 = vmov 0   ;;  %s96_s23 = sshll.u32 %s203_s3, 4  ;;  %s97_s23 = int_to_ptr.hbm [resolvable:$true] %s96_s23 }
   0x6   :  { %v31_v2 = vld [vmem:[#allocation2 + $0x10] sm:$0xff]  ;;  %v33_v3 = vadd.f32 %v30_v1, %v29_v0  ;;  %v38_v4 = vmul.f32 %v29_v0, %v29_v0  ;;  %v39_v5 = vmul.f32 %v30_v1, %v30_v1  ;;  %v32_v6 = vld [vmem:[#allocation2 + $0x18] sm:$0xff]  ;;  %109 = vset.pattern.permute.xlu1 %v166_v14  ;;  %110 = vset.pattern.permute.xlu0 %v166_v14  ;;  %v62_v28 = vld [vmem:[%s201_s1] sm:$0xff]  ;;  %s167_s1 = smov [#allocation5]  }
   0x7   :  { %v40_v8 = vmul.f32 %v31_v2, %v31_v2  ;;  %v41_v11 = vmul.f32 %v32_v6, %v32_v6  ;;  %v63_v32 = vld [vmem:[%s202_s2] sm:$0xff]  ;;  %s94_s20 = sshll.u32 %s167_s1, 4  ;;  %s95_s20 = int_to_ptr.vmem [resolvable:$true] %s94_s20 }
   0x8   :  { %v34_v7 = vadd.f32 %v33_v3, %v31_v2  ;;  %v42_v9 = vadd.f32 %v39_v5, %v38_v4 }
   0xa   :  { %v35_v10 = vadd.f32 %v34_v7, %v32_v6  ;;  %v43_v12 = vadd.f32 %v42_v9, %v40_v8 }
   0xc   :  { %36 = vadd.xlane.f32.xlu0 %v35_v10  ;;  %v44_v13 = vadd.f32 %v43_v12, %v41_v11 }
  0x14   :  { %45 = vadd.xlane.f32.xlu0 %v44_v13 }
  0x7f   :  { %v37_v15 = vpop.xlane.xlu0 %36 }
  0x80   :  { %v47_v16 = vmul.f32 0.001953125, %v37_v15 }
  0x82   :  { %v49_v18 = vmul.f32 %v47_v16, %v47_v16 }
  0x87   :  { %v46_v17 = vpop.xlane.xlu0 %45 }
  0x88   :  { %v48_v19 = vmul.f32 0.001953125, %v46_v17 }
  0x8a   :  { %v50_v20 = vsub.f32 %v48_v19, %v49_v18 }
  0x8c   :  { %v51_v21 = vadd.f32 1e-06, %v50_v20 }
  0x8e   :  { %111 = vrsqrt.f32 %v51_v21  ;;  %vm58_vm1 = vweird.f32 %v51_v21 }
  0x94   :  { %v112_v22 = vpop.eup %111 }
  0x95   :  { %v53_v23 = vmul.f32 %v112_v22, %v51_v21  ;;  %vm59_vm0 = vweird.f32 %v112_v22 }
  0x96   :  { %vm60_vm2 = vmor %vm58_vm1, %vm59_vm0 }
  0x97   :  { %v54_v24 = vmul.f32 %v112_v22, %v53_v23 }
  0x99   :  { %v55_v25 = vmul.f32 0.5, %v54_v24 }
  0x9b   :  { %v56_v26 = vsub.f32 1.5, %v55_v25 }
  0x9d   :  { %v57_v27 = vmul.f32 %v112_v22, %v56_v26 }
  0x9f   :  { %v61_v29 = vsel %vm60_vm2, %v112_v22, %v57_v27 }
  0xa0   :  { %v64_v30 = vmul.f32 %v62_v28, %v61_v29 }
  0xa2   :  { %69 = vperm.xlu1 %109, %v64_v30   ;;  %v65_v31 = vmul.f32 %v64_v30, %v47_v16 }
  0xa4   :  { %v66_v33 = vsub.f32 %v63_v32, %v65_v31 }
  0xaa   :  { %78 = vperm.xlu1 %109, %v66_v33  }
 0x114   :  { %v70_v34 = vpop.permute.xlu1 %69 }
 0x115   :  { %v72_v35 = vmul.f32 %v70_v34, %v29_v0  ;;  %v73_v36 = vmul.f32 %v70_v34, %v30_v1  ;;  %v74_v37 = vmul.f32 %v70_v34, %v31_v2  ;;  %v75_v38 = vmul.f32 %v70_v34, %v32_v6 }
 0x11c   :  { %v79_v39 = vpop.permute.xlu1 %78 }
 0x11d   :  { %v81_v40 = vadd.f32 %v79_v39, %v72_v35  ;;  %v82_v41 = vadd.f32 %v79_v39, %v73_v36  ;;  %v83_v42 = vadd.f32 %v79_v39, %v74_v37  ;;  %v84_v43 = vadd.f32 %v79_v39, %v75_v38 }
 0x11f   :  { %85 = vst [vmem:[#allocation5] sm:$0xff] %v81_v40 }
 0x120   :  { %86 = vst [vmem:[#allocation5 + $0x8] sm:$0xff] %v82_v41 }
 0x121   :  { %87 = vst [vmem:[#allocation5 + $0x10] sm:$0xff] %v83_v42 }
 0x122   :  { %88 = vst [vmem:[#allocation5 + $0x18] sm:$0xff] %v84_v43 }
 0x123   :  { %99 = dma.vmem_to_hbm [thread:$0]  %s95_s20, 512, %s97_s23, [#allocation4]  }
 0x124   :  { %163 = dma.done.wait [#allocation4], 512  }
 0x125   :  { %164 = vsyncadd [#allocation4], 4294966784 }
 0x126   :  { %104 = vsyncpa [#allocation3], 1 }
 0x127   :  { %105 = vsyncpa [#allocation4], 1 }

</bundles_post_ra>
